<compile_context>
chip_gen: v7x
topology: tpu7x:2x2x1
jax: 0.10.0
libtpu: 0.0.40
codegen_flags: <defaults>
</compile_context>

<pallas_src>
import math

import jax
import jax.numpy as jnp
from jax.experimental import pallas as pl
from jax.experimental.pallas import tpu as pltpu


def _round_up(x, m):
    return ((x + m - 1) // m) * m


# ----------------------------------------------------------------------------
# Kernel
# ----------------------------------------------------------------------------
def mgru_cell_kernel(x_ref, h_ref, w_ref, b_ref, out_ref):
    """One batch tile of the minimal-GRU cell.

    x_ref  : (tm, I_p)           input tile               (compute dtype)
    h_ref  : (tm, H_p)           previous hidden tile     (state dtype, f32)
    w_ref  : (I_p + H_p, 2*H_p)  [[Wz|Wn],[Uz|Un]]        (compute dtype, resident)
    b_ref  : (1, 2*H_p)          [bias_z | bias_n]        (f32, resident)
    out_ref: (tm, H_p)           new hidden tile          (state dtype)
    """
    hp = out_ref.shape[-1]
    compute_dtype = w_ref.dtype

    h_f32 = h_ref[...].astype(jnp.float32)           # single load; reused for z*h
    xh = jnp.concatenate(
        [x_ref[...].astype(compute_dtype), h_f32.astype(compute_dtype)], axis=-1)

    # One MXU pass over the fused (I_p+H_p, 2*H_p) weight; f32 accumulation.
    pre = jnp.dot(xh, w_ref[...], preferred_element_type=jnp.float32) + b_ref[...]

    # hp is a multiple of 128, so these slices are lane-tile aligned (free).
    z = jax.nn.sigmoid(pre[:, :hp])
    n = jnp.maximum(pre[:, hp:], 0.0)                 # relu

    out_ref[...] = ((1.0 - z) * n + z * h_f32).astype(out_ref.dtype)


# ----------------------------------------------------------------------------
# One-time parameter packing (hoisted out of the per-step call path)
# ----------------------------------------------------------------------------
def prepare_mgru_params(weight_ih, weight_hh, bias, *,
                        compute_dtype=jnp.bfloat16):
    """Split per gate, transpose to (K, H), zero-pad K/H to 128 multiples, and
    stack into a single (I_p+H_p, 2*H_p) matrix in `compute_dtype`. Call ONCE
    at parameter-load time. Padded rows/cols are zero, so real columns are
    unchanged."""
    two_h, input_size = weight_ih.shape
    hidden_size = two_h // 2
    ip = _round_up(input_size, 128)
    hp = _round_up(hidden_size, 128)

    def pad_t(m, rows, cols):
        mt = m.T
        return jnp.pad(mt, ((0, rows - mt.shape[0]), (0, cols - mt.shape[1])))

    w_z = pad_t(weight_ih[:hidden_size], ip, hp)      # (I_p, H_p)
    w_n = pad_t(weight_ih[hidden_size:], ip, hp)
    u_z = pad_t(weight_hh[:hidden_size], hp, hp)      # (H_p, H_p)
    u_n = pad_t(weight_hh[hidden_size:], hp, hp)

    w_big = jnp.concatenate(
        [jnp.concatenate([w_z, w_n], axis=1),         # (I_p, 2*H_p)
         jnp.concatenate([u_z, u_n], axis=1)],        # (H_p, 2*H_p)
        axis=0).astype(compute_dtype)                 # (I_p+H_p, 2*H_p)

    if bias is None:
        bias = jnp.zeros((2 * hidden_size,), jnp.float32)
    bias = bias.astype(jnp.float32)
    b_z = jnp.pad(bias[:hidden_size], (0, hp - hidden_size))
    b_n = jnp.pad(bias[hidden_size:], (0, hp - hidden_size))
    b_big = jnp.concatenate([b_z, b_n]).reshape(1, 2 * hp)

    return dict(w=w_big, b=b_big,
                input_size=input_size, hidden_size=hidden_size,
                ip=ip, hp=hp, compute_dtype=compute_dtype)


def _choose_tm(batch, block_batch):
    """Tile rows: multiple of 8, <= block_batch, low padding waste, and >= 2
    tiles whenever the batch allows (v7x 2-TC sharding of the parallel axis)."""
    b8 = _round_up(max(batch, 1), 8)
    if b8 <= 8:
        return 8
    tm = min(block_batch, _round_up((b8 + 1) // 2, 8))
    return max(tm, 8)


# ----------------------------------------------------------------------------
# Per-step wrapper
# ----------------------------------------------------------------------------
def mgru_cell(x, h, params, *, block_batch=256):
    """x: (B, I), h: (B, H) state (f32 recommended). Returns new h: (B, H)."""
    batch, input_size = x.shape
    hidden_size = params["hidden_size"]
    assert input_size == params["input_size"]
    assert h.shape == (batch, hidden_size)

    ip, hp = params["ip"], params["hp"]
    compute_dtype = params["compute_dtype"]
    state_dtype = h.dtype

    tm = _choose_tm(batch, block_batch)
    bp = _round_up(batch, tm)

    # TODO(synk): for recurrent use, keep x/h in this packed (bp, *_p) layout
    # across steps (pad/cast once per sequence, slice once at the end) instead
    # of paying these wrapper passes every step.
    x_pad = jnp.pad(x, ((0, bp - batch), (0, ip - input_size))).astype(compute_dtype)
    h_pad = jnp.pad(h, ((0, bp - batch), (0, hp - hidden_size)))

    csz = jnp.dtype(compute_dtype).itemsize
    ssz = jnp.dtype(state_dtype).itemsize

    # VMEM budget: weights/bias single-buffered (Buffered(1)); x/h/out tiles
    # double-buffered; plus kernel intermediates (xh concat, f32 pre/z/n).
    weight_bytes = (ip + hp) * (2 * hp) * csz + (2 * hp) * 4
    tile_bytes = 2 * (tm * ip * csz + 2 * tm * hp * ssz)
    scratch_bytes = tm * (ip + hp) * csz + 3 * tm * (2 * hp) * 4
    vmem_needed = weight_bytes + tile_bytes + scratch_bytes
    vmem_limit = int(min(48 * 1024 * 1024,
                         max(32 * 1024 * 1024, int(vmem_needed * 1.25))))

    grid = (bp // tm,)

    cost = pl.CostEstimate(
        flops=int(2 * bp * (ip + hp) * (2 * hp) + 6 * bp * hp),
        transcendentals=int(bp * hp),
        bytes_accessed=int(weight_bytes
                           + bp * ip * csz          # x
                           + bp * hp * ssz          # h
                           + bp * hp * ssz),        # out
    )

    out = pl.pallas_call(
        mgru_cell_kernel,
        out_shape=jax.ShapeDtypeStruct((bp, hp), state_dtype),
        grid=grid,
        in_specs=[
            pl.BlockSpec((tm, ip), lambda i: (i, 0)),          # x tile (pipelined)
            pl.BlockSpec((tm, hp), lambda i: (i, 0)),          # h tile (pipelined)
            pl.BlockSpec((ip + hp, 2 * hp), lambda i: (0, 0),  # fused W (resident)
                         pipeline_mode=pl.Buffered(buffer_count=1)),
            pl.BlockSpec((1, 2 * hp), lambda i: (0, 0),        # fused bias (resident)
                         pipeline_mode=pl.Buffered(buffer_count=1)),
        ],
        out_specs=pl.BlockSpec((tm, hp), lambda i: (i, 0)),
        compiler_params=pltpu.CompilerParams(
            dimension_semantics=("parallel",),                 # megacore / v7x 2-TC
            vmem_limit_bytes=vmem_limit,
        ),
        cost_estimate=cost,
    )(x_pad, h_pad, params["w"], params["b"])

    return out[:batch, :hidden_size]


# ----------------------------------------------------------------------------
# Pure-JAX reference matching the PyTorch forward
# ----------------------------------------------------------------------------
def mgru_cell_ref(x, h, weight_ih, weight_hh, bias):
    ih = x @ weight_ih.T + bias
    hh = h @ weight_hh.T
    hidden = h.shape[-1]
    z = jax.nn.sigmoid(ih[:, :hidden] + hh[:, :hidden])
    n = jnp.maximum(ih[:, hidden:] + hh[:, hidden:], 0.0)
    return (1.0 - z) * n + z * h


if __name__ == "__main__":
    batch = 8
    input_size = 16
    hidden_size = 32

    key = jax.random.PRNGKey(0)
    k_x, k_h, k_wih, k_whh, k_b = jax.random.split(key, 5)

    # Deterministic parameter init mirroring reset_parameters():
    # uniform(-stdv, stdv), stdv = 1/sqrt(hidden_size)
    stdv = 1.0 / math.sqrt(hidden_size)
    weight_ih = jax.random.uniform(
        k_wih, (2 * hidden_size, input_size), jnp.float32, -stdv, stdv)
    weight_hh = jax.random.uniform(
        k_whh, (2 * hidden_size, hidden_size), jnp.float32, -stdv, stdv)
    bias = jax.random.uniform(
        k_b, (2 * hidden_size,), jnp.float32, -stdv, stdv)

    x = jax.random.normal(k_x, (batch, input_size), jnp.float32)
    h0 = jax.random.normal(k_h, (batch, hidden_size), jnp.float32)

    h_expected = mgru_cell_ref(x, h0, weight_ih, weight_hh, bias)

    # 1) f32 matmul path: tight accuracy check (test only; slow on MXU).
    params_f32 = prepare_mgru_params(weight_ih, weight_hh, bias,
                                     compute_dtype=jnp.float32)
    h_f32 = jax.block_until_ready(mgru_cell(x, h0, params_f32))
    assert h_f32.shape == (batch, hidden_size)
    assert jnp.allclose(h_f32, h_expected, atol=1e-4, rtol=1e-4), (
        "f32 kernel mismatch")

    # 2) bf16 matmul path (MXU-native, production default): f32 accumulation +
    #    f32 gate math keeps error at the bf16-operand level only.
    params_bf16 = prepare_mgru_params(weight_ih, weight_hh, bias,
                                      compute_dtype=jnp.bfloat16)
    h_bf16 = jax.block_until_ready(mgru_cell(x, h0, params_bf16))
    assert h_bf16.shape == (batch, hidden_size)
    assert jnp.allclose(h_bf16, h_expected, atol=2e-2, rtol=2e-2), (
        "bf16 kernel mismatch")

    # TODO(synk): grad_clip only installs a backward-pass gradient hook in
    # PyTorch; it has no effect on forward semantics, so it is omitted here.
    print("KERNEL_OK")
</pallas_src>

<mosaic_0001>
module attributes {stable_mosaic.version = 11 : i64} {
  func.func @mgru_cell_kernel(%arg0: i32, %arg1: memref<8x128xf32, #tpu.memory_space<vmem>>, %arg2: memref<8x128xf32, #tpu.memory_space<vmem>>, %arg3: memref<256x256xf32, #tpu.memory_space<vmem>>, %arg4: memref<1x256xf32, #tpu.memory_space<vmem>>, %arg5: memref<8x128xf32, #tpu.memory_space<vmem>>) attributes {dimension_semantics = [#tpu.dimension_semantics<parallel>], iteration_bounds = array<i64: 1>, scalar_prefetch = 0 : i64, scratch_operands = 0 : i64, tpu.core_type = #tpu.core_type<tc>, window_params = [{transform_indices = @transform_0, window_bounds = array<i64: 8, 128>}, {transform_indices = @transform_1, window_bounds = array<i64: 8, 128>}, {pipeline_mode = #tpu.pipeline_mode<synchronous>, transform_indices = @transform_2, window_bounds = array<i64: 256, 256>}, {pipeline_mode = #tpu.pipeline_mode<synchronous>, transform_indices = @transform_3, window_bounds = array<i64: 1, 256>}, {transform_indices = @transform_4, window_bounds = array<i64: 8, 128>}]} {
    %c0 = arith.constant 0 : index
    %c0_0 = arith.constant 0 : index
    %0 = vector.load %arg2[%c0, %c0_0] : memref<8x128xf32, #tpu.memory_space<vmem>>, vector<8x128xf32>
    %c0_1 = arith.constant 0 : index
    %c0_2 = arith.constant 0 : index
    %1 = vector.load %arg1[%c0_1, %c0_2] : memref<8x128xf32, #tpu.memory_space<vmem>>, vector<8x128xf32>
    %2 = tpu.concatenate %1, %0 in 1 : vector<8x128xf32>, vector<8x128xf32> -> vector<8x256xf32>
    %c0_3 = arith.constant 0 : index
    %c0_4 = arith.constant 0 : index
    %3 = vector.load %arg3[%c0_3, %c0_4] : memref<256x256xf32, #tpu.memory_space<vmem>>, vector<256x256xf32>
    %cst = arith.constant dense<0.000000e+00> : vector<8x256xf32>
    %4 = tpu.matmul %2, %3, %cst {dimension_numbers = #tpu.dot_dimension_numbers<[1], [0], [0], [1], [0, 0, 1, 1], [], []>} : vector<8x256xf32>, vector<256x256xf32>, vector<8x256xf32> -> vector<8x256xf32>
    %c0_5 = arith.constant 0 : index
    %c0_6 = arith.constant 0 : index
    %5 = vector.load %arg4[%c0_5, %c0_6] : memref<1x256xf32, #tpu.memory_space<vmem>>, vector<1x256xf32>
    %6 = vector.broadcast %5 : vector<1x256xf32> to vector<8x256xf32>
    %7 = arith.addf %4, %6 : vector<8x256xf32>
    %8 = vector.extract_strided_slice %7 {offsets = [0, 0], sizes = [8, 128], strides = [1, 1]} : vector<8x256xf32> to vector<8x128xf32>
    %9 = arith.negf %8 : vector<8x128xf32>
    %10 = math.exp %9 : vector<8x128xf32>
    %cst_7 = arith.constant 1.000000e+00 : f32
    %11 = vector.broadcast %cst_7 : f32 to vector<8x128xf32>
    %12 = arith.addf %11, %10 : vector<8x128xf32>
    %13 = arith.divf %11, %12 : vector<8x128xf32>
    %14 = vector.extract_strided_slice %7 {offsets = [0, 128], sizes = [8, 128], strides = [1, 1]} : vector<8x256xf32> to vector<8x128xf32>
    %cst_8 = arith.constant 0.000000e+00 : f32
    %15 = vector.broadcast %cst_8 : f32 to vector<8x128xf32>
    %16 = arith.maximumf %14, %15 : vector<8x128xf32>
    %cst_9 = arith.constant 1.000000e+00 : f32
    %17 = vector.broadcast %cst_9 : f32 to vector<8x128xf32>
    %18 = arith.subf %17, %13 : vector<8x128xf32>
    %19 = arith.mulf %18, %16 : vector<8x128xf32>
    %20 = arith.mulf %13, %0 : vector<8x128xf32>
    %21 = arith.addf %19, %20 : vector<8x128xf32>
    %c0_10 = arith.constant 0 : index
    %c0_11 = arith.constant 0 : index
    %22 = vector.load %arg5[%c0_10, %c0_11] : memref<8x128xf32, #tpu.memory_space<vmem>>, vector<8x128xf32>
    tpu.vector_store %arg5[%c0_10, %c0_11], %21 {strides = array<i32>} : memref<8x128xf32, #tpu.memory_space<vmem>>, vector<8x128xf32>,
    return
  }
  func.func @transform_0(%arg0: i32) -> (i32, i32) {
    %c0_i32 = arith.constant 0 : i32
    %c0_i32_0 = arith.constant 0 : i32
    return %arg0, %c0_i32 : i32, i32
  }
  func.func @transform_1(%arg0: i32) -> (i32, i32) {
    %c0_i32 = arith.constant 0 : i32
    %c0_i32_0 = arith.constant 0 : i32
    return %arg0, %c0_i32 : i32, i32
  }
  func.func @transform_2(%arg0: i32) -> (i32, i32) {
    %c0_i32 = arith.constant 0 : i32
    %c0_i32_0 = arith.constant 0 : i32
    %c0_i32_1 = arith.constant 0 : i32
    return %c0_i32, %c0_i32_0 : i32, i32
  }
  func.func @transform_3(%arg0: i32) -> (i32, i32) {
    %c0_i32 = arith.constant 0 : i32
    %c0_i32_0 = arith.constant 0 : i32
    %c0_i32_1 = arith.constant 0 : i32
    return %c0_i32, %c0_i32_0 : i32, i32
  }
  func.func @transform_4(%arg0: i32) -> (i32, i32) {
    %c0_i32 = arith.constant 0 : i32
    %c0_i32_0 = arith.constant 0 : i32
    return %arg0, %c0_i32 : i32, i32
  }
}

</mosaic_0001>

<bundles_post_ra>
// kernel: tpu_custom_call.1
= control target key start
LH: loop header
LB: loop body
LE: loop exit
PB: predicated region body
PF: predicated region fallthrough
CT: control target
= control target key end

     0   :  { %9 = vsyncpa [#allocation3], 0  ;;  %s487_s0 = inlined_call_operand.hbm [shape: f32[8,128], index: 0, kind: input, shape index: {}]   ;;  %s488_s1 = inlined_call_operand.hbm [shape: f32[8,128], index: 1, kind: input, shape index: {}]   ;;  %s489_s2 = inlined_call_operand.hbm [shape: f32[256,256], index: 2, kind: input, shape index: {}]   ;;  %s490_s3 = inlined_call_operand.vmem [shape: f32[1,256], index: 3, kind: input, shape index: {}]   ;;  %s491_s4 = inlined_call_operand.hbm [shape: f32[8,128], index: 4, kind: output, shape index: {}]  }
   0x1   :  { %10 = vsyncpa [#allocation6], 0 }
   0x2   :  { %11 = vsyncpa [#allocation4], 0  ;;  %s401_s15 = smov [#allocation5]   ;;  %s402_s17 = smov [#allocation2]  }
   0x3   :  { %s28_s16 = sshll.u32 %s401_s15, 4  ;;  %s18_s18 = sshll.u32 %s402_s17, 4  ;;  %s29_s16 = int_to_ptr.vmem [resolvable:$true] %s28_s16  ;;  %s19_s18 = int_to_ptr.vmem [resolvable:$true] %s18_s18 }
   0x4   :  { %s307_s21 = scalar_lea.hbm %s488_s1, 128 }
   0x5   :  { %p308_p0 = scmp.ne.s32.totalorder %s488_s1, %s307_s21  ;;  %p311_p1 = scmp.lt.u32.totalorder %s307_s21, %s488_s1 }
   0x7   :  { %p313_p2 = pnand %p311_p1, %p308_p0 }
   0x9   :  { %316 = shalt.err (!%p313_p2)
}
   0xa   :  { %s317_s26 = scalar_lea.vmem %s29_s16, 128  ;;  %p322_p4 = scmp.lt.s32.totalorder %s29_s16, %s29_s16 }
   0xb   :  { %p318_p3 = scmp.ne.s32.totalorder %s29_s16, %s317_s26  ;;  %p323_p5 = scmp.lt.s32.totalorder %s317_s26, %s317_s26 }
   0xd   :  { %p324_p6 = por %p323_p5, %p322_p4 }
   0xf   :  { %p325_p7 = pnand %p324_p6, %p318_p3 }
  0x11   :  { %328 = shalt.err (!%p325_p7)
}
  0x12   :  { %31 = dma.hbm_to_vmem [thread:$0]  %s488_s1, 128, %s29_s16, [#allocation6]  }
  0x13   :  { %s329_s5 = scalar_lea.hbm %s487_s0, 128 }
  0x14   :  { %p330_p8 = scmp.ne.s32.totalorder %s487_s0, %s329_s5  ;;  %p333_p9 = scmp.lt.u32.totalorder %s329_s5, %s487_s0 }
  0x16   :  { %p335_p10 = pnand %p333_p9, %p330_p8 }
  0x18   :  { %338 = shalt.err (!%p335_p10)
}
  0x19   :  { %s339_s10 = scalar_lea.vmem %s19_s18, 128  ;;  %p344_p12 = scmp.lt.s32.totalorder %s19_s18, %s19_s18 }
  0x1a   :  { %p340_p11 = scmp.ne.s32.totalorder %s19_s18, %s339_s10  ;;  %p345_p13 = scmp.lt.s32.totalorder %s339_s10, %s339_s10 }
  0x1c   :  { %p346_p0 = por %p345_p13, %p344_p12 }
  0x1e   :  { %p347_p1 = pnand %p346_p0, %p340_p11 }
  0x20   :  { %350 = shalt.err (!%p347_p1)
}
  0x21   :  { %21 = dma.hbm_to_vmem [thread:$0]  %s487_s0, 128, %s19_s18, [#allocation3]  }
  0x22   :  { %s403_s12 = smov [#allocation7]   ;;  %s351_s16 = scalar_lea.hbm %s489_s2, 8192 }
  0x23   :  { %s37_s13 = sshll.u32 %s403_s12, 4  ;;  %p352_p2 = scmp.ne.s32.totalorder %s489_s2, %s351_s16  ;;  %s38_s13 = int_to_ptr.vmem [resolvable:$true] %s37_s13 }
  0x24   :  { %p355_p3 = scmp.lt.u32.totalorder %s351_s16, %s489_s2 }
  0x26   :  { %p357_p4 = pnand %p355_p3, %p352_p2 }
  0x28   :  { %360 = shalt.err (!%p357_p4)
}
  0x29   :  { %s361_s22 = scalar_lea.vmem %s38_s13, 8192  ;;  %p366_p6 = scmp.lt.s32.totalorder %s38_s13, %s38_s13 }
  0x2a   :  { %p362_p5 = scmp.ne.s32.totalorder %s38_s13, %s361_s22  ;;  %p367_p7 = scmp.lt.s32.totalorder %s361_s22, %s361_s22 }
  0x2c   :  { %p368_p8 = por %p367_p7, %p366_p6 }
  0x2e   :  { %p369_p9 = pnand %p368_p8, %p362_p5 }
  0x30   :  { %372 = shalt.err (!%p369_p9)
}
  0x31   :  { %s404_s0 = smov 256   ;;  %s405_s18 = smov 16  }
  0x32   :  { %43 = dma.hbm_to_vmem [thread:$0]  %s489_s2, 8192, %s38_s13, [#allocation6], %s404_s0, %s404_s0, %s405_s18  }
  0x33   :  { %395 = dma.done.wait [#allocation3], 128  }
  0x34   :  { %396 = vsyncadd [#allocation3], 4294967168 }
  0x35   :  { %397 = dma.done.wait [#allocation6], 8320  }
  0x36   :  { %398 = vsyncadd [#allocation6], 4294958976  ;;  %v58_v0 = vld [vmem:[#allocation7 + $0x8] sm:$0xff]  ;;  %v60_v1 = vld [vmem:[#allocation7 + $0x18] sm:$0xff]  ;;  %s406_s26 = smov [#allocation8]  }
  0x37   :  { %v57_v2 = vld [vmem:[#allocation7] sm:$0xff]  ;;  %v233_v3 = vpack.c.bf16 %v60_v1, %v58_v0  ;;  %v59_v4 = vld [vmem:[#allocation7 + $0x10] sm:$0xff]  ;;  %v62_v5 = vld [vmem:[#allocation7 + $0x28] sm:$0xff]  ;;  %s222_s27 = sshll.u32 %s406_s26, 4  ;;  %s223_s27 = int_to_ptr.vmem [resolvable:$true] %s222_s27 }
  0x38   :  { %v64_v6 = vld [vmem:[#allocation7 + $0x38] sm:$0xff]  ;;  %v235_v7 = vpack.c.bf16 %v59_v4, %v57_v2  ;;  %v61_v9 = vld [vmem:[#allocation7 + $0x20] sm:$0xff]  ;;  %v63_v10 = vld [vmem:[#allocation7 + $0x30] sm:$0xff]  ;;  %p378_p11 = scmp.lt.s32.totalorder %s223_s27, %s223_s27 }
  0x39   :  { %v237_v8 = vpack.c.bf16 %v64_v6, %v62_v5  ;;  %v66_v11 = vld [vmem:[#allocation7 + $0x48] sm:$0xff]  ;;  %234 = vmatprep.subr.bf16.mxu0 %v233_v3  ;;  %v68_v12 = vld [vmem:[#allocation7 + $0x58] sm:$0xff]  ;;  %v239_v13 = vpack.c.bf16 %v63_v10, %v61_v9  ;;  %v65_v15 = vld [vmem:[#allocation7 + $0x40] sm:$0xff] }
  0x3a   :  { %236 = vmatpush1.bf16.msra.mxu0 %v235_v7  ;;  %v241_v14 = vpack.c.bf16 %v68_v12, %v66_v11  ;;  %v67_v16 = vld [vmem:[#allocation7 + $0x50] sm:$0xff]  ;;  %v70_v17 = vld [vmem:[#allocation7 + $0x68] sm:$0xff]  ;;  %v72_v18 = vld [vmem:[#allocation7 + $0x78] sm:$0xff] }
  0x3b   :  { %238 = vmatprep.subr.bf16.mxu0 %v237_v8  ;;  %v243_v19 = vpack.c.bf16 %v67_v16, %v65_v15  ;;  %v245_v20 = vpack.c.bf16 %v72_v18, %v70_v17  ;;  %v69_v21 = vld [vmem:[#allocation7 + $0x60] sm:$0xff]  ;;  %v71_v22 = vld [vmem:[#allocation7 + $0x70] sm:$0xff]  ;;  %v74_v23 = vld [vmem:[#allocation7 + $0x88] sm:$0xff] }
  0x3c   :  { %v76_v24 = vld [vmem:[#allocation7 + $0x98] sm:$0xff]  ;;  %v247_v25 = vpack.c.bf16 %v71_v22, %v69_v21  ;;  %v73_v27 = vld [vmem:[#allocation7 + $0x80] sm:$0xff]  ;;  %v75_v28 = vld [vmem:[#allocation7 + $0x90] sm:$0xff] }
  0x3d   :  { %v249_v26 = vpack.c.bf16 %v76_v24, %v74_v23  ;;  %v78_v29 = vld [vmem:[#allocation7 + $0xa8] sm:$0xff]  ;;  %v80_v30 = vld [vmem:[#allocation7 + $0xb8] sm:$0xff]  ;;  %v251_v31 = vpack.c.bf16 %v75_v28, %v73_v27  ;;  %v77_v33 = vld [vmem:[#allocation7 + $0xa0] sm:$0xff] }
  0x3e   :  { %240 = vmatpush1.bf16.msra.mxu0 %v239_v13  ;;  %v253_v32 = vpack.c.bf16 %v80_v30, %v78_v29  ;;  %v79_v34 = vld [vmem:[#allocation7 + $0xb0] sm:$0xff]  ;;  %v82_v35 = vld [vmem:[#allocation7 + $0xc8] sm:$0xff]  ;;  %v84_v36 = vld [vmem:[#allocation7 + $0xd8] sm:$0xff] }
  0x3f   :  { %242 = vmatprep.subr.bf16.mxu0 %v241_v14  ;;  %v255_v37 = vpack.c.bf16 %v79_v34, %v77_v33  ;;  %v257_v38 = vpack.c.bf16 %v84_v36, %v82_v35  ;;  %v81_v39 = vld [vmem:[#allocation7 + $0xc0] sm:$0xff]  ;;  %v83_v40 = vld [vmem:[#allocation7 + $0xd0] sm:$0xff]  ;;  %v468_v41 = vld [vmem:[#allocation5] sm:$0xff]  ;;  %v123_v34 = vlaneseq }
  0x40   :  { %v86_v42 = vld [vmem:[#allocation7 + $0xe8] sm:$0xff]  ;;  %v88_v43 = vld [vmem:[#allocation7 + $0xf8] sm:$0xff]  ;;  %197 = vmatprep.mubr.f32.mxu0 %v468_v41  ;;  %v259_v44 = vpack.c.bf16 %v83_v40, %v81_v39  ;;  %v85_v46 = vld [vmem:[#allocation7 + $0xe0] sm:$0xff] }
  0x41   :  { %v261_v45 = vpack.c.bf16 %v88_v43, %v86_v42  ;;  %v87_v47 = vld [vmem:[#allocation7 + $0xf0] sm:$0xff]  ;;  %v90_v48 = vld [vmem:[#allocation7 + $0x108] sm:$0xff]  ;;  %v92_v49 = vld [vmem:[#allocation7 + $0x118] sm:$0xff]  ;;  %v124_v35 = vshrl.u32 %v123_v34, 7 }
  0x42   :  { %244 = vmatpush1.bf16.msra.mxu0 %v243_v19  ;;  %v263_v50 = vpack.c.bf16 %v87_v47, %v85_v46  ;;  %v265_v51 = vpack.c.bf16 %v92_v49, %v90_v48  ;;  %v89_v52 = vld [vmem:[#allocation7 + $0x100] sm:$0xff]  ;;  %v91_v53 = vld [vmem:[#allocation7 + $0x110] sm:$0xff]  ;;  %v94_v54 = vld [vmem:[#allocation7 + $0x128] sm:$0xff] }
  0x43   :  { %246 = vmatprep.subr.bf16.mxu0 %v245_v20  ;;  %v96_v55 = vld [vmem:[#allocation7 + $0x138] sm:$0xff]  ;;  %v267_v56 = vpack.c.bf16 %v91_v53, %v89_v52  ;;  %v93_v58 = vld [vmem:[#allocation7 + $0x120] sm:$0xff]  ;;  %v95_v59 = vld [vmem:[#allocation7 + $0x130] sm:$0xff]  ;;  %v125_v36 = vsub.s32 0, %v124_v35  ;;  %v129_v46 = vsub.s32 1, %v124_v35 }
  0x44   :  { %v269_v57 = vpack.c.bf16 %v96_v55, %v94_v54  ;;  %v98_v60 = vld [vmem:[#allocation7 + $0x148] sm:$0xff]  ;;  %v100_v61 = vld [vmem:[#allocation7 + $0x158] sm:$0xff]  ;;  %v271_v62 = vpack.c.bf16 %v95_v59, %v93_v58  ;;  %v97_v0 = vld [vmem:[#allocation7 + $0x140] sm:$0xff] }
  0x45   :  { %v273_v63 = vpack.c.bf16 %v100_v61, %v98_v60  ;;  %v99_v1 = vld [vmem:[#allocation7 + $0x150] sm:$0xff]  ;;  %v102_v2 = vld [vmem:[#allocation7 + $0x168] sm:$0xff]  ;;  %v104_v3 = vld [vmem:[#allocation7 + $0x178] sm:$0xff] }
  0x46   :  { %248 = vmatpush1.bf16.msra.mxu0 %v247_v25  ;;  %v275_v4 = vpack.c.bf16 %v99_v1, %v97_v0  ;;  %v277_v5 = vpack.c.bf16 %v104_v3, %v102_v2  ;;  %v101_v6 = vld [vmem:[#allocation7 + $0x160] sm:$0xff]  ;;  %v103_v7 = vld [vmem:[#allocation7 + $0x170] sm:$0xff]  ;;  %v106_v8 = vld [vmem:[#allocation7 + $0x188] sm:$0xff] }
  0x47   :  { %250 = vmatprep.subr.bf16.mxu0 %v249_v26  ;;  %v108_v9 = vld [vmem:[#allocation7 + $0x198] sm:$0xff]  ;;  %v279_v10 = vpack.c.bf16 %v103_v7, %v101_v6  ;;  %v105_v12 = vld [vmem:[#allocation7 + $0x180] sm:$0xff]  ;;  %v107_v13 = vld [vmem:[#allocation7 + $0x190] sm:$0xff] }
  0x48   :  { %v281_v11 = vpack.c.bf16 %v108_v9, %v106_v8  ;;  %v110_v14 = vld [vmem:[#allocation7 + $0x1a8] sm:$0xff]  ;;  %v112_v15 = vld [vmem:[#allocation7 + $0x1b8] sm:$0xff]  ;;  %v283_v16 = vpack.c.bf16 %v107_v13, %v105_v12  ;;  %v109_v18 = vld [vmem:[#allocation7 + $0x1a0] sm:$0xff] }
  0x49   :  { %v285_v17 = vpack.c.bf16 %v112_v15, %v110_v14  ;;  %v111_v19 = vld [vmem:[#allocation7 + $0x1b0] sm:$0xff]  ;;  %v114_v20 = vld [vmem:[#allocation7 + $0x1c8] sm:$0xff]  ;;  %v116_v21 = vld [vmem:[#allocation7 + $0x1d8] sm:$0xff] }
  0x4a   :  { %252 = vmatpush1.bf16.msra.mxu0 %v251_v31  ;;  %v287_v22 = vpack.c.bf16 %v111_v19, %v109_v18  ;;  %v289_v23 = vpack.c.bf16 %v116_v21, %v114_v20  ;;  %v113_v24 = vld [vmem:[#allocation7 + $0x1c0] sm:$0xff]  ;;  %v115_v25 = vld [vmem:[#allocation7 + $0x1d0] sm:$0xff]  ;;  %v118_v26 = vld [vmem:[#allocation7 + $0x1e8] sm:$0xff] }
  0x4b   :  { %254 = vmatprep.subr.bf16.mxu0 %v253_v32  ;;  %v120_v27 = vld [vmem:[#allocation7 + $0x1f8] sm:$0xff]  ;;  %v291_v28 = vpack.c.bf16 %v115_v25, %v113_v24  ;;  %v117_v30 = vld [vmem:[#allocation7 + $0x1e0] sm:$0xff]  ;;  %v119_v31 = vld [vmem:[#allocation7 + $0x1f0] sm:$0xff] }
  0x4c   :  { %v293_v29 = vpack.c.bf16 %v120_v27, %v118_v26  ;;  %v295_v32 = vpack.c.bf16 %v119_v31, %v117_v30  ;;  %v56_v33 = vld [vmem:[#allocation2] sm:$0xff] }
  0x4e   :  { %256 = vmatpush1.bf16.msra.mxu0 %v255_v37  ;;  %v121_v37 = vld [vmem:[%s490_s3] sm:$0x3]  ;;  %s373_s3 = scalar_lea.vmem %s223_s27, 128 }
  0x4f   :  { %258 = vmatprep.subr.bf16.mxu0 %v257_v38  ;;  %v126_v38 = vrot.slane %v121_v37, %v125_v36  ;;  %v130_v47 = vrot.slane %v121_v37, %v129_v46  ;;  %p374_p10 = scmp.ne.s32.totalorder %s223_s27, %s373_s3  ;;  %p379_p12 = scmp.lt.s32.totalorder %s373_s3, %s373_s3 }
  0x51   :  { %p380_p13 = por %p379_p12, %p378_p11 }
  0x52   :  { %260 = vmatpush1.bf16.msra.mxu0 %v259_v44 }
  0x53   :  { %262 = vmatprep.subr.bf16.mxu0 %v261_v45  ;;  %p381_p0 = pnand %p380_p13, %p374_p10 }
  0x56   :  { %264 = vmatpush1.bf16.msra.mxu0 %v263_v50 }
  0x57   :  { %266 = vmatprep.subr.bf16.mxu0 %v265_v51 }
  0x5a   :  { %268 = vmatpush1.bf16.msra.mxu0 %v267_v56 }
  0x5b   :  { %270 = vmatprep.subr.bf16.mxu0 %v269_v57 }
  0x5e   :  { %272 = vmatpush1.bf16.msra.mxu0 %v271_v62 }
  0x5f   :  { %274 = vmatprep.subr.bf16.mxu0 %v273_v63 }
  0x62   :  { %276 = vmatpush1.bf16.msra.mxu0 %v275_v4 }
  0x63   :  { %278 = vmatprep.subr.bf16.mxu0 %v277_v5 }
  0x66   :  { %280 = vmatpush1.bf16.msra.mxu0 %v279_v10 }
  0x67   :  { %282 = vmatprep.subr.bf16.mxu0 %v281_v11 }
  0x6a   :  { %284 = vmatpush1.bf16.msra.mxu0 %v283_v16 }
  0x6b   :  { %286 = vmatprep.subr.bf16.mxu0 %v285_v17 }
  0x6e   :  { %288 = vmatpush1.bf16.msra.mxu0 %v287_v22 }
  0x6f   :  { %290 = vmatprep.subr.bf16.mxu0 %v289_v23 }
  0x72   :  { %292 = vmatpush1.bf16.msra.mxu0 %v291_v28 }
  0x73   :  { %294 = vmatprep.subr.bf16.mxu0 %v293_v29 }
  0x76   :  { %296 = vmatpush1.bf16.msra.mxu0 %v295_v32 }
  0x79   :  { %198 = vmatmul.mubr.f32.vlgmr.msra.gmra.mrb[0].mxu0 %v56_v33 }
 0x14c   :  { %v199_v39 = vpop.f32.mrb[0].mxu0 }
 0x14d   :  { %v200_v40 = vadd.f32 %v199_v39, %v126_v38  ;;  %v201_v42 = vpop.f32.mrb[1].mxu0 }
 0x14e   :  { %v202_v48 = vadd.f32 %v201_v42, %v130_v47 }
 0x14f   :  { %v232_v43 = vmul.f32 -1.442695, %v200_v40 }
 0x150   :  { %v210_v50 = vmax.f32 %v202_v48, 0.0 }
 0x151   :  { %303 = vpow2.f32 %v232_v43 }
 0x15b   :  { %v304_v44 = vpop.eup %303 }
 0x15c   :  { %v207_v45 = vadd.f32 1.0, %v304_v44 }
 0x15e   :  { %305 = vrcp.f32 %v207_v45 }
 0x168   :  { %v306_v49 = vpop.eup %305 }
 0x169   :  { %v211_v51 = vsub.f32 1.0, %v306_v49  ;;  %v213_v53 = vmul.f32 %v306_v49, %v468_v41 }
 0x16b   :  { %v212_v52 = vmul.f32 %v211_v51, %v210_v50 }
 0x16d   :  { %v214_v54 = vadd.f32 %v213_v53, %v212_v52 }
 0x16f   :  { %215 = vst [vmem:[#allocation8] sm:$0xff] %v214_v54 }
 0x170   :  { %384 = shalt.err (!%p381_p0)
}
 0x171   :  { %s385_s30 = scalar_lea.hbm %s491_s4, 128 }
 0x172   :  { %p386_p1 = scmp.ne.s32.totalorder %s491_s4, %s385_s30  ;;  %p389_p2 = scmp.lt.u32.totalorder %s385_s30, %s491_s4 }
 0x174   :  { %p391_p3 = pnand %p389_p2, %p386_p1 }
 0x176   :  { %394 = shalt.err (!%p391_p3)
}
 0x177   :  { %225 = dma.vmem_to_hbm [thread:$0]  %s223_s27, 128, %s491_s4, [#allocation4]  }
 0x178   :  { %399 = dma.done.wait [#allocation4], 128  }
 0x179   :  { %400 = vsyncadd [#allocation4], 4294967168 }
 0x17a   :  { %229 = vsyncpa [#allocation3], 1 }
 0x17b   :  { %230 = vsyncpa [#allocation6], 1 }
 0x17c   :  { %231 = vsyncpa [#allocation4], 1 }

</bundles_post_ra>
